<compile_context>
chip_gen: v6e
topology: v6e:2x2x1
jax: 0.10.0
libtpu: 0.0.40
codegen_flags: <defaults>
</compile_context>

<pallas_src>
import math

import jax
import jax.numpy as jnp
from jax.experimental import pallas as pl
from jax.experimental.pallas import tpu as pltpu


_LANE_CANDIDATES = (8192, 4096, 2048, 1024, 512, 256, 128)
_TARGET_TILE_BYTES = 2 * 1024 * 1024  # ~2 MiB per block -> 8 MiB resident w/ dbl-buffered in+out


def _bias_kernel(bias_ref, x_ref, o_ref):
    # bias_ref: SMEM scalar (shape (1,), f32); x_ref/o_ref: VMEM tiles.
    # Compute in f32 (matches torch promotion for f32/bf16 activations), then
    # cast to the promoted output dtype. VPU has huge slack; do NOT broadcast
    # the bias to a tile.
    o_ref[...] = (x_ref[...].astype(jnp.float32) + bias_ref[0]).astype(o_ref.dtype)


def bias_forward(x: jax.Array, bias: jax.Array) -> jax.Array:
    """y = x + bias (bias shape (1,)), elementwise add in a tiled Pallas kernel."""
    orig_shape = x.shape
    out_dtype = jnp.result_type(x.dtype, bias.dtype)

    total = math.prod(orig_shape) if orig_shape else 1
    if total == 0:
        return jnp.zeros(orig_shape, out_dtype)

    # ---- pick a lane-dense last dimension L (multiple of 128) -------------
    L = None
    for cand in _LANE_CANDIDATES:
        if total % cand == 0:
            L = cand
            break

    flat = x.reshape(-1)
    padded = False
    if L is None:
        # Fallback: pad the flat array up to a multiple of 1024 lanes.
        L = 1024
        padded_total = ((total + L - 1) // L) * L
        flat = jnp.pad(flat, (0, padded_total - total))
        padded = True

    rows = flat.shape[0] // L
    x2d = flat.reshape(rows, L)

    # ---- row tiling: largest ~2 MiB block, multiple of 8 sublanes ---------
    itemsize = max(jnp.dtype(x.dtype).itemsize, jnp.dtype(out_dtype).itemsize)
    rows_per_tile = max(8, (_TARGET_TILE_BYTES // (L * itemsize)) // 8 * 8)
    if rows <= rows_per_tile:
        tile_r = rows                      # single full block (equals full dim)
        grid = (1,)
    else:
        tile_r = rows_per_tile             # multiple of 8; last block may be ragged
        grid = (pl.cdiv(rows, tile_r),)

    bias_scalar = bias.reshape(-1).astype(jnp.float32)  # (1,) scalar in SMEM

    out2d = pl.pallas_call(
        _bias_kernel,
        out_shape=jax.ShapeDtypeStruct((rows, L), out_dtype),
        grid=grid,
        in_specs=[
            pl.BlockSpec(memory_space=pltpu.MemorySpace.SMEM),   # scalar bias, untiled
            pl.BlockSpec((tile_r, L), lambda i: (i, 0)),         # lane-dense input tile
        ],
        out_specs=pl.BlockSpec((tile_r, L), lambda i: (i, 0)),
        compiler_params=pltpu.CompilerParams(
            dimension_semantics=("parallel",),                   # megacore sharding on v7x
        ),
    )(bias_scalar, x2d)

    out_flat = out2d.reshape(-1)
    if padded:
        out_flat = out_flat[:total]
    return out_flat.reshape(orig_shape)


class BiasPallas:
    """Mirror of abstract_layers.Bias: self.bias = bias_value * ones(1)."""

    def __init__(self, bias: float = 0.0, fixed: bool = False):
        # Deterministic parameter init, matching nn.Parameter(bias * torch.ones(1)).
        self.bias = jnp.full((1,), bias, dtype=jnp.float32)
        self.fixed = fixed  # gradient flag only; irrelevant for forward

    def __call__(self, x: jax.Array) -> jax.Array:
        return bias_forward(x, self.bias)


if __name__ == "__main__":
    key = jax.random.PRNGKey(0)
    # NCHW conv-style activation, small shapes.
    x = jax.random.normal(key, (2, 4, 16, 16), dtype=jnp.float32)

    layer = BiasPallas(bias=0.5)
    y = layer(x)
    y = jax.block_until_ready(y)

    ref = x + layer.bias  # broadcasting reference, same as torch x + bias
    assert y.shape == x.shape and y.dtype == ref.dtype
    assert jnp.allclose(y, ref, atol=1e-6, rtol=1e-6)
    print("KERNEL_OK")
</pallas_src>

<mosaic_0001>
module attributes {stable_mosaic.version = 11 : i64} {
  func.func @_bias_kernel(%arg0: i32, %arg1: memref<1xf32, #tpu.memory_space<smem>>, %arg2: memref<1x2048xf32, #tpu.memory_space<vmem>>, %arg3: memref<1x2048xf32, #tpu.memory_space<vmem>>) attributes {dimension_semantics = [#tpu.dimension_semantics<parallel>], iteration_bounds = array<i64: 1>, scalar_prefetch = 0 : i64, scratch_operands = 0 : i64, tpu.core_type = #tpu.core_type<tc>, window_params = [{transform_indices = @transform_0, window_bounds = array<i64: 1>}, {transform_indices = @transform_1, window_bounds = array<i64: 1, 2048>}, {transform_indices = @transform_2, window_bounds = array<i64: 1, 2048>}]} {
    %c0 = arith.constant 0 : index
    %c0_0 = arith.constant 0 : index
    %0 = vector.load %arg2[%c0, %c0_0] : memref<1x2048xf32, #tpu.memory_space<vmem>>, vector<1x2048xf32>
    %c0_1 = arith.constant 0 : index
    %1 = memref.load %arg1[%c0_1] : memref<1xf32, #tpu.memory_space<smem>>
    %2 = vector.broadcast %1 : f32 to vector<1x2048xf32>
    %3 = arith.addf %0, %2 : vector<1x2048xf32>
    %c0_2 = arith.constant 0 : index
    %c0_3 = arith.constant 0 : index
    %4 = vector.load %arg3[%c0_2, %c0_3] : memref<1x2048xf32, #tpu.memory_space<vmem>>, vector<1x2048xf32>
    tpu.vector_store %arg3[%c0_2, %c0_3], %3 {strides = array<i32>} : memref<1x2048xf32, #tpu.memory_space<vmem>>, vector<1x2048xf32>,
    return
  }
  func.func @transform_0(%arg0: i32) -> i32 {
    %c0_i32 = arith.constant 0 : i32
    %c0_i32_0 = arith.constant 0 : i32
    return %c0_i32 : i32
  }
  func.func @transform_1(%arg0: i32) -> (i32, i32) {
    %c0_i32 = arith.constant 0 : i32
    %c0_i32_0 = arith.constant 0 : i32
    return %arg0, %c0_i32 : i32, i32
  }
  func.func @transform_2(%arg0: i32) -> (i32, i32) {
    %c0_i32 = arith.constant 0 : i32
    %c0_i32_0 = arith.constant 0 : i32
    return %arg0, %c0_i32 : i32, i32
  }
}

</mosaic_0001>

<bundles_post_ra>
// kernel: tpu_custom_call.1
= control target key start
LH: loop header
LB: loop body
LE: loop exit
PB: predicated region body
PF: predicated region fallthrough
CT: control target
= control target key end

     0   :  { %8 = vsyncpa [#allocation4], 0  ;;  %s120_s0 = inlined_call_operand.<no memory space> [shape: f32[1], index: 0, kind: input, shape index: {}]   ;;  %s121_s1 = inlined_call_operand.hbm [shape: f32[1,2048], index: 1, kind: input, shape index: {}]   ;;  %s122_s2 = inlined_call_operand.hbm [shape: f32[1,2048], index: 2, kind: output, shape index: {}]  }
   0x1   :  { %9 = vsyncpa [#allocation5], 0  ;;  %s94_s9 = smov [#allocation3]  }
   0x2   :  { %s18_s10 = sshll.u32 %s94_s9, 4  ;;  %s19_s10 = int_to_ptr.vmem [resolvable:$true] %s18_s10 }
   0x3   :  { %s58_s11 = scalar_lea.vmem %s19_s10, 256  ;;  %p63_p1 = scmp.lt.s32.totalorder %s19_s10, %s19_s10 }
   0x4   :  { %p59_p0 = scmp.ne.s32.totalorder %s19_s10, %s58_s11  ;;  %p64_p2 = scmp.lt.s32.totalorder %s58_s11, %s58_s11 }
   0x6   :  { %p65_p3 = por %p64_p2, %p63_p1 }
   0x8   :  { %p66_p4 = pnand %p65_p3, %p59_p0 }
   0xa   :  { %69 = shalt.err (!%p66_p4)
}
   0xb   :  { %21 = dma.hbm_to_vmem [thread:$0]  %s121_s1, 256, %s19_s10, [#allocation4]  }
   0xc   :  { %90 = dma.done.wait [#allocation4], 256  }
   0xd   :  { %91 = vsyncadd [#allocation4], 4294967040  ;;  %v28_v0 = vstv %s120_s0  ;;  %s95_s16 = smov [#allocation6]   ;;  %v25_v1 = vld [vmem:[#allocation3] sm:$0xff]  ;;  %v26_v2 = vld [vmem:[#allocation3 + $0x8] sm:$0xff] }
   0xe   :  { %s39_s17 = sshll.u32 %s95_s16, 4  ;;  %v29_v3 = vadd.f32 %v28_v0, %v25_v1  ;;  %v30_v4 = vadd.f32 %v28_v0, %v26_v2  ;;  %s40_s17 = int_to_ptr.vmem [resolvable:$true] %s39_s17 }
   0xf   :  { %s70_s18 = scalar_lea.vmem %s40_s17, 256  ;;  %p75_p6 = scmp.lt.s32.totalorder %s40_s17, %s40_s17 }
  0x10   :  { %31 = vst [vmem:[#allocation6] sm:$0xff] %v29_v3  ;;  %32 = vst [vmem:[#allocation6 + $0x8] sm:$0xff] %v30_v4  ;;  %p71_p5 = scmp.ne.s32.totalorder %s40_s17, %s70_s18  ;;  %p76_p7 = scmp.lt.s32.totalorder %s70_s18, %s70_s18 }
  0x12   :  { %p77_p8 = por %p76_p7, %p75_p6 }
  0x14   :  { %p78_p9 = pnand %p77_p8, %p71_p5 }
  0x16   :  { %81 = shalt.err (!%p78_p9)
}
  0x17   :  { %42 = dma.vmem_to_hbm [thread:$0]  %s40_s17, 256, %s122_s2, [#allocation5]  }
  0x18   :  { %92 = dma.done.wait [#allocation5], 256  }
  0x19   :  { %93 = vsyncadd [#allocation5], 4294967040 }
  0x1a   :  { %46 = vsyncpa [#allocation4], 1 }
  0x1b   :  { %47 = vsyncpa [#allocation5], 1 }

</bundles_post_ra>
